<compile_context>
chip_gen: v6e
topology: v6e:2x2x1
jax: 0.10.0
libtpu: 0.0.40
codegen_flags: <defaults>
</compile_context>

<pallas_src>
import jax
import jax.numpy as jnp
from jax.experimental import pallas as pl
from jax.experimental.pallas import tpu as pltpu

LATENTS = 47          # obs is viewed to (1, 47) in forward()
RECURRENTS = 64       # latent_space / LSTM hidden dim
ACTIONS = 3           # action_dim (small, synthetic)
N_PAD = 128           # lane-dense output slab (ACTIONS padded to one vreg lane width)
TM_MAX = 512          # max rows per grid step (whole batch if it fits in one tile)


def _controller_kernel(obs_ref, h_ref, wo_ref, wh_ref, b_ref, out_ref):
    # Fused cat -> linear:  out = obs @ W_obs + h @ W_h + b  (f32 accumulate on MXU).
    acc = jnp.dot(obs_ref[...], wo_ref[...], preferred_element_type=jnp.float32)
    acc = acc + jnp.dot(h_ref[...], wh_ref[...], preferred_element_type=jnp.float32)
    out_ref[...] = (acc + b_ref[...]).astype(out_ref.dtype)


def _pad_rows(x, rows):
    return jnp.pad(x, ((0, rows - x.shape[0]), (0, 0)))


def _pad_cols(x, cols):
    return jnp.pad(x, ((0, 0), (0, cols - x.shape[1])))


def _controller_forward_batched_impl(obs, h, w, b):
    """obs: (B, 47), h: (B, 64), w: (111, ACTIONS), b: (1, ACTIONS) -> (B, ACTIONS).

    One pallas_call for all B rows; grid over row tiles of `tm` rows
    (tm == padded B for B <= TM_MAX, i.e. a single grid step).
    """
    B = obs.shape[0]
    obs = obs.reshape(B, LATENTS)
    h = h.reshape(B, RECURRENTS)

    # Pre-split the weight at trace time (outside the kernel) so the row split
    # at 47 never happens inside the kernel; pad the output / bias lanes to a
    # full 128-wide slab for unmasked stores.
    w_obs = _pad_cols(w[:LATENTS, :], N_PAD)          # (47, 128)
    w_h = _pad_cols(w[LATENTS:, :], N_PAD)            # (64, 128)
    b_pad = _pad_cols(b.reshape(1, ACTIONS), N_PAD)   # (1, 128)

    # Adaptive row tile: biggest tile that fits (problem is tiny), so small
    # batches are a single grid step; big batches tile at TM_MAX.
    b8 = ((B + 7) // 8) * 8                   # f32 sublane multiple
    tm = b8 if b8 <= TM_MAX else TM_MAX
    b_rows = ((B + tm - 1) // tm) * tm
    obs_p = _pad_rows(obs, b_rows)
    h_p = _pad_rows(h, b_rows)

    vmem = pltpu.MemorySpace.VMEM
    out = pl.pallas_call(
        _controller_kernel,
        out_shape=jax.ShapeDtypeStruct((b_rows, N_PAD), jnp.float32),
        grid_spec=pltpu.PrefetchScalarGridSpec(
            num_scalar_prefetch=0,
            grid=(b_rows // tm,),
            in_specs=[
                pl.BlockSpec((tm, LATENTS), lambda i: (i, 0), memory_space=vmem),
                pl.BlockSpec((tm, RECURRENTS), lambda i: (i, 0), memory_space=vmem),
                # Weights / bias: same block every grid step -> stay resident.
                pl.BlockSpec((LATENTS, N_PAD), lambda i: (0, 0), memory_space=vmem),
                pl.BlockSpec((RECURRENTS, N_PAD), lambda i: (0, 0), memory_space=vmem),
                pl.BlockSpec((1, N_PAD), lambda i: (0, 0), memory_space=vmem),
            ],
            out_specs=pl.BlockSpec((tm, N_PAD), lambda i: (i, 0), memory_space=vmem),
        ),
        compiler_params=pltpu.CompilerParams(
            # Row tiles are independent: v7x splits them across its two
            # TensorCores; harmless (single TC) on v5e/v6e.
            dimension_semantics=("parallel",),
        ),
    )(obs_p, h_p, w_obs, w_h, b_pad)

    return out[:B, :ACTIONS]


# Jit the wrapper so the pad/split/slice glue fuses and dispatch is one launch.
controller_forward_batched = jax.jit(_controller_forward_batched_impl)


def controller_forward(obs, h, w, b):
    """Exact Controller.forward semantics: obs.view(1,47); cat([obs, h]); fc(state)."""
    obs = obs.reshape(1, LATENTS)
    h = h.reshape(1, RECURRENTS)
    return controller_forward_batched(obs, h, w, b)


def init_params(key):
    """Deterministic init mirroring nn.Linear default (uniform +/- 1/sqrt(fan_in))."""
    din = LATENTS + RECURRENTS
    kw, kb = jax.random.split(key)
    bound = 1.0 / jnp.sqrt(jnp.float32(din))
    w = jax.random.uniform(kw, (din, ACTIONS), jnp.float32, -bound, bound)
    b = jax.random.uniform(kb, (1, ACTIONS), jnp.float32, -bound, bound)
    return w, b


if __name__ == "__main__":
    key = jax.random.PRNGKey(0)
    k_obs, k_h, k_param, k_bobs, k_bh = jax.random.split(key, 5)

    w, b = init_params(k_param)

    # ---- Single-step call: exactly the PyTorch module's forward (B = 1) ----
    obs = jax.random.normal(k_obs, (1, LATENTS), jnp.float32)   # viewed to (1,47)
    h = jax.random.normal(k_h, (1, RECURRENTS), jnp.float32)

    out1 = jax.block_until_ready(controller_forward(obs, h, w, b))
    ref1 = jnp.concatenate([obs.reshape(1, LATENTS), h], axis=-1) @ w + b
    assert out1.shape == (1, ACTIONS)
    assert jnp.allclose(out1, ref1, atol=1e-5), "single-step mismatch vs reference"

    # ---- Batched rollout path: B controller steps in one pallas_call ----
    Bv = 16
    obs_b = jax.random.normal(k_bobs, (Bv, LATENTS), jnp.float32)
    h_b = jax.random.normal(k_bh, (Bv, RECURRENTS), jnp.float32)

    out_b = jax.block_until_ready(controller_forward_batched(obs_b, h_b, w, b))
    ref_b = jnp.concatenate([obs_b, h_b], axis=-1) @ w + b
    assert out_b.shape == (Bv, ACTIONS)
    assert jnp.allclose(out_b, ref_b, atol=1e-5), "batched mismatch vs reference"

    print("KERNEL_OK")
</pallas_src>

<mosaic_0001>
module attributes {stable_mosaic.version = 11 : i64} {
  func.func @_controller_kernel(%arg0: i32, %arg1: memref<8x47xf32, #tpu.memory_space<vmem>>, %arg2: memref<8x64xf32, #tpu.memory_space<vmem>>, %arg3: memref<47x128xf32, #tpu.memory_space<vmem>>, %arg4: memref<64x128xf32, #tpu.memory_space<vmem>>, %arg5: memref<1x128xf32, #tpu.memory_space<vmem>>, %arg6: memref<8x128xf32, #tpu.memory_space<vmem>>) attributes {dimension_semantics = [#tpu.dimension_semantics<parallel>], iteration_bounds = array<i64: 1>, scalar_prefetch = 0 : i64, scratch_operands = 0 : i64, tpu.core_type = #tpu.core_type<tc>, window_params = [{transform_indices = @transform_0, window_bounds = array<i64: 8, 47>}, {transform_indices = @transform_1, window_bounds = array<i64: 8, 64>}, {pipeline_mode = #tpu.pipeline_mode<synchronous>, transform_indices = @transform_2, window_bounds = array<i64: 47, 128>}, {pipeline_mode = #tpu.pipeline_mode<synchronous>, transform_indices = @transform_3, window_bounds = array<i64: 64, 128>}, {pipeline_mode = #tpu.pipeline_mode<synchronous>, transform_indices = @transform_4, window_bounds = array<i64: 1, 128>}, {transform_indices = @transform_5, window_bounds = array<i64: 8, 128>}]} {
    %c0 = arith.constant 0 : index
    %c0_0 = arith.constant 0 : index
    %0 = vector.load %arg1[%c0, %c0_0] : memref<8x47xf32, #tpu.memory_space<vmem>>, vector<8x47xf32>
    %c0_1 = arith.constant 0 : index
    %c0_2 = arith.constant 0 : index
    %1 = vector.load %arg3[%c0_1, %c0_2] : memref<47x128xf32, #tpu.memory_space<vmem>>, vector<47x128xf32>
    %cst = arith.constant dense<0.000000e+00> : vector<8x128xf32>
    %2 = tpu.matmul %0, %1, %cst {dimension_numbers = #tpu.dot_dimension_numbers<[1], [0], [0], [1], [0, 0, 1, 1], [], []>} : vector<8x47xf32>, vector<47x128xf32>, vector<8x128xf32> -> vector<8x128xf32>
    %c0_3 = arith.constant 0 : index
    %c0_4 = arith.constant 0 : index
    %3 = vector.load %arg2[%c0_3, %c0_4] : memref<8x64xf32, #tpu.memory_space<vmem>>, vector<8x64xf32>
    %c0_5 = arith.constant 0 : index
    %c0_6 = arith.constant 0 : index
    %4 = vector.load %arg4[%c0_5, %c0_6] : memref<64x128xf32, #tpu.memory_space<vmem>>, vector<64x128xf32>
    %cst_7 = arith.constant dense<0.000000e+00> : vector<8x128xf32>
    %5 = tpu.matmul %3, %4, %cst_7 {dimension_numbers = #tpu.dot_dimension_numbers<[1], [0], [0], [1], [0, 0, 1, 1], [], []>} : vector<8x64xf32>, vector<64x128xf32>, vector<8x128xf32> -> vector<8x128xf32>
    %6 = arith.addf %2, %5 : vector<8x128xf32>
    %c0_8 = arith.constant 0 : index
    %c0_9 = arith.constant 0 : index
    %7 = vector.load %arg5[%c0_8, %c0_9] : memref<1x128xf32, #tpu.memory_space<vmem>>, vector<1x128xf32>
    %8 = vector.broadcast %7 : vector<1x128xf32> to vector<8x128xf32>
    %9 = arith.addf %6, %8 : vector<8x128xf32>
    %c0_10 = arith.constant 0 : index
    %c0_11 = arith.constant 0 : index
    %10 = vector.load %arg6[%c0_10, %c0_11] : memref<8x128xf32, #tpu.memory_space<vmem>>, vector<8x128xf32>
    tpu.vector_store %arg6[%c0_10, %c0_11], %9 {strides = array<i32>} : memref<8x128xf32, #tpu.memory_space<vmem>>, vector<8x128xf32>,
    return
  }
  func.func @transform_0(%arg0: i32) -> (i32, i32) {
    %c0_i32 = arith.constant 0 : i32
    %c0_i32_0 = arith.constant 0 : i32
    return %arg0, %c0_i32 : i32, i32
  }
  func.func @transform_1(%arg0: i32) -> (i32, i32) {
    %c0_i32 = arith.constant 0 : i32
    %c0_i32_0 = arith.constant 0 : i32
    return %arg0, %c0_i32 : i32, i32
  }
  func.func @transform_2(%arg0: i32) -> (i32, i32) {
    %c0_i32 = arith.constant 0 : i32
    %c0_i32_0 = arith.constant 0 : i32
    %c0_i32_1 = arith.constant 0 : i32
    return %c0_i32, %c0_i32_0 : i32, i32
  }
  func.func @transform_3(%arg0: i32) -> (i32, i32) {
    %c0_i32 = arith.constant 0 : i32
    %c0_i32_0 = arith.constant 0 : i32
    %c0_i32_1 = arith.constant 0 : i32
    return %c0_i32, %c0_i32_0 : i32, i32
  }
  func.func @transform_4(%arg0: i32) -> (i32, i32) {
    %c0_i32 = arith.constant 0 : i32
    %c0_i32_0 = arith.constant 0 : i32
    %c0_i32_1 = arith.constant 0 : i32
    return %c0_i32, %c0_i32_0 : i32, i32
  }
  func.func @transform_5(%arg0: i32) -> (i32, i32) {
    %c0_i32 = arith.constant 0 : i32
    %c0_i32_0 = arith.constant 0 : i32
    return %arg0, %c0_i32 : i32, i32
  }
}

</mosaic_0001>

<bundles_post_ra>
// kernel: _controller_forward_batched_impl.1
= control target key start
LH: loop header
LB: loop body
LE: loop exit
PB: predicated region body
PF: predicated region fallthrough
CT: control target
= control target key end

     0   :  { %vm114_vm0 = vcmask 1046528   ;;  %v257_v0 = vmov 0.0   ;;  %vm110_vm1 = vcmask 384000   ;;  %vm258_vm2 = vmmov 0   ;;  %s343_s3 = inlined_call_operand.vmem [shape: f32[64,128], index: 3, kind: input, shape index: {}]   ;;  %s344_s2 = inlined_call_operand.vmem [shape: f32[47,128], index: 2, kind: input, shape index: {}]   ;;  %s345_s0 = inlined_call_operand.vmem [shape: f32[8,47], index: 0, kind: input, shape index: {}]   ;;  %s346_s1 = inlined_call_operand.vmem [shape: f32[8,64], index: 1, kind: input, shape index: {}]   ;;  %s347_s4 = inlined_call_operand.vmem [shape: f32[1,128], index: 4, kind: input, shape index: {}]   ;;  %s348_s5 = inlined_call_operand.vmem [shape: f32[8,128], index: 5, kind: output, shape index: {}]  }
   0x1   :  { %221 = vmatprep.subr.mxu0 %v257_v0  ;;  %v35_v1 = vld [vmem:[%s343_s3 + $0x38] sm:$0xff]  ;;  %240 = vmatprep.subr.mxu1 %v257_v0  ;;  %v34_v2 = vld [vmem:[%s343_s3 + $0x30] sm:$0xff]  ;;  %v26_v3 = vld [vmem:[%s344_s2 + $0x28] sm:$0x7f]  ;;  %vm36_vm3 = vcmask 523264  }
   0x2   :  { %222 = vmatpush3.msra.mxu0 %v35_v1  ;;  %241 = vmatpush3.msk.msra.mxu1 %vm114_vm0, %v26_v3  ;;  %v25_v4 = vld [vmem:[%s344_s2 + $0x20] sm:$0xff]  ;;  %v33_v5 = vld [vmem:[%s343_s3 + $0x28] sm:$0xff]  ;;  %v24_v6 = vld [vmem:[%s344_s2 + $0x18] sm:$0xff] }
   0x3   :  { %223 = vmatprep.subr.mxu0 %v257_v0  ;;  %242 = vmatprep.subr.mxu1 %v257_v0  ;;  %v32_v7 = vld [vmem:[%s343_s3 + $0x20] sm:$0xff]  ;;  %v23_v8 = vld [vmem:[%s344_s2 + $0x10] sm:$0xff]  ;;  %v31_v9 = vld [vmem:[%s343_s3 + $0x18] sm:$0xff] }
   0x4   :  { %224 = vmatpush3.msra.mxu0 %v34_v2  ;;  %243 = vmatpush3.msra.mxu1 %v25_v4  ;;  %v22_v10 = vld [vmem:[%s344_s2 + $0x8] sm:$0xff]  ;;  %v30_v11 = vld [vmem:[%s343_s3 + $0x10] sm:$0xff]  ;;  %v21_v12 = vld [vmem:[%s344_s2] sm:$0xff] }
   0x5   :  { %225 = vmatprep.subr.mxu0 %v257_v0  ;;  %244 = vmatprep.subr.mxu1 %v257_v0  ;;  %v29_v13 = vld [vmem:[%s343_s3 + $0x8] sm:$0xff]  ;;  %v20_v14 = vld [vmem:[%s345_s0] sm:$0xff] }
   0x6   :  { %226 = vmatpush3.msra.mxu0 %v33_v5  ;;  %245 = vmatpush3.msra.mxu1 %v24_v6  ;;  %v28_v15 = vld [vmem:[%s343_s3] sm:$0xff] }
   0x7   :  { %227 = vmatprep.subr.mxu0 %v257_v0  ;;  %246 = vmatprep.subr.mxu1 %v257_v0  ;;  %v27_v16 = vld [vmem:[%s346_s1] sm:$0xff] }
   0x8   :  { %228 = vmatpush3.msra.mxu0 %v32_v7  ;;  %247 = vmatpush3.msra.mxu1 %v23_v8  ;;  %v204_v20 = vld [vmem:[%s347_s4] ss:$0 sm:$0xff] }
   0x9   :  { %229 = vmatprep.subr.mxu0 %v257_v0  ;;  %248 = vmatprep.subr.mxu1 %v257_v0 }
   0xa   :  { %230 = vmatpush3.msra.mxu0 %v31_v9  ;;  %249 = vmatpush3.msra.mxu1 %v22_v10 }
   0xb   :  { %231 = vmatprep.subr.mxu0 %v257_v0  ;;  %250 = vmatprep.subr.mxu1 %v257_v0 }
   0xc   :  { %232 = vmatpush3.msra.mxu0 %v30_v11  ;;  %251 = vmatpush3.msra.mxu1 %v21_v12 }
   0xd   :  { %233 = vmatprep.subr.mxu0 %v257_v0  ;;  %252 = vmatprep.mubr.msk.f32.mxu1 %vm258_vm2, %v257_v0 }
   0xe   :  { %234 = vmatpush3.msra.mxu0 %v29_v13  ;;  %253 = vmatmul.mubr.msk.f32.vlgmr.msra.gmra.mxu1 %vm110_vm1, %v20_v14 }
   0xf   :  { %235 = vmatprep.subr.mxu0 %v257_v0  ;;  %237 = vmatprep.mubr.msk.f32.mxu0 %vm258_vm2, %v257_v0 }
  0x10   :  { %236 = vmatpush3.msra.mxu0 %v28_v15 }
  0x11   :  { %238 = vmatmul.mubr.msk.f32.vlgmr.msra.gmra.mxu0 %vm36_vm3, %v27_v16 }
  0xce   :  { %v184_v17 = vpop.f32.mrf.mxu1 }
  0xd0   :  { %v254_v18 = vpop.f32.mrf.mxu1 }
  0xd1   :  { %v106_v19 = vpop.f32.mrf.mxu0 }
  0xd2   :  { %v185_v21 = vadd.f32 %v184_v17, %v106_v19 }
  0xd3   :  { %v239_v22 = vpop.f32.mrf.mxu0 }
  0xd4   :  { %v195_v23 = vadd.f32 %v204_v20, %v185_v21 }
  0xd6   :  { %196 = vst [vmem:[%s348_s5] sm:$0xff] %v195_v23 }

</bundles_post_ra>
